<compile_context>
chip_gen: v5e
topology: v5e:2x2
jax: 0.10.0
libtpu: 0.0.40
codegen_flags: <defaults>
</compile_context>

<pallas_src>
import jax
import jax.numpy as jnp
from jax import lax
from jax.experimental import pallas as pl
from jax.experimental.pallas import tpu as pltpu


def resnet_kernel(x_ref, w1_ref, b1_ref, w2_ref, b2_ref, o_ref):
    num_blocks = w1_ref.shape[0]

    def block(i, x):
        # x: (B, D) f32 running activation (kept in f32 across all blocks).
        h = jnp.dot(x, w1_ref[i], preferred_element_type=jnp.float32) + b1_ref[i]
        h = jnp.maximum(h, 0.0)                                   # ReLU
        y = jnp.dot(h, w2_ref[i], preferred_element_type=jnp.float32) + b2_ref[i]
        return x + y                                              # residual add

    x = x_ref[...].astype(jnp.float32)
    x = lax.fori_loop(0, num_blocks, block, x, unroll=True)
    o_ref[...] = x.astype(o_ref.dtype)


def _round_up(n, m):
    return ((n + m - 1) // m) * m


@jax.jit
def resnet_forward(x, w1, b1, w2, b2):
    B, D = x.shape
    num_blocks, _, H = w1.shape

    # Pad to lane-dense (multiple of 128) feature dims and sublane-friendly
    # batch. Zero padding is exact for this network (padded lanes remain zero
    # through matmul + ReLU + residual) and is sliced off at the end.
    B_p = _round_up(B, 8)
    D_p = _round_up(D, 128)
    H_p = _round_up(H, 128)

    xp = jnp.pad(x, ((0, B_p - B), (0, D_p - D)))
    w1p = jnp.pad(w1, ((0, 0), (0, D_p - D), (0, H_p - H)))
    b1p = jnp.pad(b1, ((0, 0), (0, 0), (0, H_p - H)))
    w2p = jnp.pad(w2, ((0, 0), (0, H_p - H), (0, D_p - D)))
    b2p = jnp.pad(b2, ((0, 0), (0, 0), (0, D_p - D)))

    out = pl.pallas_call(
        resnet_kernel,
        out_shape=jax.ShapeDtypeStruct((B_p, D_p), x.dtype),
        grid_spec=pltpu.PrefetchScalarGridSpec(
            num_scalar_prefetch=0,
            grid=(1,),  # single invocation; blocks are looped inside the kernel
            in_specs=[
                pl.BlockSpec((B_p, D_p), lambda i: (0, 0)),              # x
                pl.BlockSpec((num_blocks, D_p, H_p), lambda i: (0, 0, 0)),  # W1 stack
                pl.BlockSpec((num_blocks, 1, H_p), lambda i: (0, 0, 0)),    # b1 stack
                pl.BlockSpec((num_blocks, H_p, D_p), lambda i: (0, 0, 0)),  # W2 stack
                pl.BlockSpec((num_blocks, 1, D_p), lambda i: (0, 0, 0)),    # b2 stack
            ],
            out_specs=pl.BlockSpec((B_p, D_p), lambda i: (0, 0)),
        ),
        compiler_params=pltpu.CompilerParams(
            dimension_semantics=("arbitrary",)),
    )(xp, w1p, b1p, w2p, b2p)

    return out[:B, :D]


def resnet_reference(x, w1, b1, w2, b2):
    # Pure-JAX reference of the same forward pass, for verification.
    for i in range(w1.shape[0]):
        h = jnp.maximum(x @ w1[i] + b1[i], 0.0)
        x = x + h @ w2[i] + b2[i]
    return x


if __name__ == "__main__":
    batch = 8
    input_dim = 32
    hidden_dim = 64
    num_blocks = 3

    key = jax.random.PRNGKey(0)
    kx, kw1, kb1, kw2, kb2 = jax.random.split(key, 5)

    x = jax.random.normal(kx, (batch, input_dim), dtype=jnp.float32)
    # Deterministic parameter init (shapes follow nn.Linear: in->hidden, hidden->in),
    # weights stored as [in_dim, out_dim] so the kernel computes x @ W + b.
    w1 = jax.random.normal(kw1, (num_blocks, input_dim, hidden_dim), jnp.float32) * 0.1
    b1 = jax.random.normal(kb1, (num_blocks, 1, hidden_dim), jnp.float32) * 0.1
    w2 = jax.random.normal(kw2, (num_blocks, hidden_dim, input_dim), jnp.float32) * 0.1
    b2 = jax.random.normal(kb2, (num_blocks, 1, input_dim), jnp.float32) * 0.1

    out = resnet_forward(x, w1, b1, w2, b2)
    jax.block_until_ready(out)

    ref = resnet_reference(x, w1, b1, w2, b2)
    assert out.shape == (batch, input_dim)
    assert jnp.allclose(out, ref, atol=1e-5, rtol=1e-5), "mismatch vs reference"

    print("KERNEL_OK")
</pallas_src>

<mosaic_0001>
module attributes {stable_mosaic.version = 11 : i64} {
  func.func @resnet_kernel(%arg0: i32, %arg1: memref<8x128xf32, #tpu.memory_space<vmem>>, %arg2: memref<3x128x128xf32, #tpu.memory_space<vmem>>, %arg3: memref<3x1x128xf32, #tpu.memory_space<vmem>>, %arg4: memref<3x128x128xf32, #tpu.memory_space<vmem>>, %arg5: memref<3x1x128xf32, #tpu.memory_space<vmem>>, %arg6: memref<8x128xf32, #tpu.memory_space<vmem>>) attributes {dimension_semantics = [#tpu.dimension_semantics<arbitrary>], iteration_bounds = array<i64: 1>, scalar_prefetch = 0 : i64, scratch_operands = 0 : i64, tpu.core_type = #tpu.core_type<tc>, window_params = [{pipeline_mode = #tpu.pipeline_mode<synchronous>, transform_indices = @transform_0, window_bounds = array<i64: 8, 128>}, {pipeline_mode = #tpu.pipeline_mode<synchronous>, transform_indices = @transform_1, window_bounds = array<i64: 3, 128, 128>}, {pipeline_mode = #tpu.pipeline_mode<synchronous>, transform_indices = @transform_2, window_bounds = array<i64: 3, 1, 128>}, {pipeline_mode = #tpu.pipeline_mode<synchronous>, transform_indices = @transform_3, window_bounds = array<i64: 3, 128, 128>}, {pipeline_mode = #tpu.pipeline_mode<synchronous>, transform_indices = @transform_4, window_bounds = array<i64: 3, 1, 128>}, {pipeline_mode = #tpu.pipeline_mode<synchronous>, transform_indices = @transform_5, window_bounds = array<i64: 8, 128>}]} {
    %c0 = arith.constant 0 : index
    %c0_0 = arith.constant 0 : index
    %0 = vector.load %arg1[%c0, %c0_0] : memref<8x128xf32, #tpu.memory_space<vmem>>, vector<8x128xf32>
    %c0_i32 = arith.constant 0 : i32
    %1 = arith.index_cast %c0_i32 : i32 to index
    %c0_1 = arith.constant 0 : index
    %c0_2 = arith.constant 0 : index
    %2 = vector.load %arg2[%1, %c0_1, %c0_2] : memref<3x128x128xf32, #tpu.memory_space<vmem>>, vector<1x128x128xf32>
    %3 = vector.shape_cast %2 : vector<1x128x128xf32> to vector<128x128xf32>
    %cst = arith.constant dense<0.000000e+00> : vector<8x128xf32>
    %4 = tpu.matmul %0, %3, %cst {dimension_numbers = #tpu.dot_dimension_numbers<[1], [0], [0], [1], [0, 0, 1, 1], [], []>} : vector<8x128xf32>, vector<128x128xf32>, vector<8x128xf32> -> vector<8x128xf32>
    %5 = arith.index_cast %c0_i32 : i32 to index
    %c0_3 = arith.constant 0 : index
    %c0_4 = arith.constant 0 : index
    %6 = vector.load %arg3[%5, %c0_3, %c0_4] : memref<3x1x128xf32, #tpu.memory_space<vmem>>, vector<1x1x128xf32>
    %7 = vector.shape_cast %6 : vector<1x1x128xf32> to vector<1x128xf32>
    %8 = vector.broadcast %7 : vector<1x128xf32> to vector<8x128xf32>
    %9 = arith.addf %4, %8 : vector<8x128xf32>
    %cst_5 = arith.constant 0.000000e+00 : f32
    %10 = vector.broadcast %cst_5 : f32 to vector<8x128xf32>
    %11 = arith.maximumf %9, %10 : vector<8x128xf32>
    %12 = arith.index_cast %c0_i32 : i32 to index
    %c0_6 = arith.constant 0 : index
    %c0_7 = arith.constant 0 : index
    %13 = vector.load %arg4[%12, %c0_6, %c0_7] : memref<3x128x128xf32, #tpu.memory_space<vmem>>, vector<1x128x128xf32>
    %14 = vector.shape_cast %13 : vector<1x128x128xf32> to vector<128x128xf32>
    %cst_8 = arith.constant dense<0.000000e+00> : vector<8x128xf32>
    %15 = tpu.matmul %11, %14, %cst_8 {dimension_numbers = #tpu.dot_dimension_numbers<[1], [0], [0], [1], [0, 0, 1, 1], [], []>} : vector<8x128xf32>, vector<128x128xf32>, vector<8x128xf32> -> vector<8x128xf32>
    %16 = arith.index_cast %c0_i32 : i32 to index
    %c0_9 = arith.constant 0 : index
    %c0_10 = arith.constant 0 : index
    %17 = vector.load %arg5[%16, %c0_9, %c0_10] : memref<3x1x128xf32, #tpu.memory_space<vmem>>, vector<1x1x128xf32>
    %18 = vector.shape_cast %17 : vector<1x1x128xf32> to vector<1x128xf32>
    %19 = vector.broadcast %18 : vector<1x128xf32> to vector<8x128xf32>
    %20 = arith.addf %15, %19 : vector<8x128xf32>
    %21 = arith.addf %0, %20 : vector<8x128xf32>
    %c1_i32 = arith.constant 1 : i32
    %22 = arith.index_cast %c1_i32 : i32 to index
    %c0_11 = arith.constant 0 : index
    %c0_12 = arith.constant 0 : index
    %23 = vector.load %arg2[%22, %c0_11, %c0_12] : memref<3x128x128xf32, #tpu.memory_space<vmem>>, vector<1x128x128xf32>
    %24 = vector.shape_cast %23 : vector<1x128x128xf32> to vector<128x128xf32>
    %cst_13 = arith.constant dense<0.000000e+00> : vector<8x128xf32>
    %25 = tpu.matmul %21, %24, %cst_13 {dimension_numbers = #tpu.dot_dimension_numbers<[1], [0], [0], [1], [0, 0, 1, 1], [], []>} : vector<8x128xf32>, vector<128x128xf32>, vector<8x128xf32> -> vector<8x128xf32>
    %26 = arith.index_cast %c1_i32 : i32 to index
    %c0_14 = arith.constant 0 : index
    %c0_15 = arith.constant 0 : index
    %27 = vector.load %arg3[%26, %c0_14, %c0_15] : memref<3x1x128xf32, #tpu.memory_space<vmem>>, vector<1x1x128xf32>
    %28 = vector.shape_cast %27 : vector<1x1x128xf32> to vector<1x128xf32>
    %29 = vector.broadcast %28 : vector<1x128xf32> to vector<8x128xf32>
    %30 = arith.addf %25, %29 : vector<8x128xf32>
    %cst_16 = arith.constant 0.000000e+00 : f32
    %31 = vector.broadcast %cst_16 : f32 to vector<8x128xf32>
    %32 = arith.maximumf %30, %31 : vector<8x128xf32>
    %33 = arith.index_cast %c1_i32 : i32 to index
    %c0_17 = arith.constant 0 : index
    %c0_18 = arith.constant 0 : index
    %34 = vector.load %arg4[%33, %c0_17, %c0_18] : memref<3x128x128xf32, #tpu.memory_space<vmem>>, vector<1x128x128xf32>
    %35 = vector.shape_cast %34 : vector<1x128x128xf32> to vector<128x128xf32>
    %cst_19 = arith.constant dense<0.000000e+00> : vector<8x128xf32>
    %36 = tpu.matmul %32, %35, %cst_19 {dimension_numbers = #tpu.dot_dimension_numbers<[1], [0], [0], [1], [0, 0, 1, 1], [], []>} : vector<8x128xf32>, vector<128x128xf32>, vector<8x128xf32> -> vector<8x128xf32>
    %37 = arith.index_cast %c1_i32 : i32 to index
    %c0_20 = arith.constant 0 : index
    %c0_21 = arith.constant 0 : index
    %38 = vector.load %arg5[%37, %c0_20, %c0_21] : memref<3x1x128xf32, #tpu.memory_space<vmem>>, vector<1x1x128xf32>
    %39 = vector.shape_cast %38 : vector<1x1x128xf32> to vector<1x128xf32>
    %40 = vector.broadcast %39 : vector<1x128xf32> to vector<8x128xf32>
    %41 = arith.addf %36, %40 : vector<8x128xf32>
    %42 = arith.addf %21, %41 : vector<8x128xf32>
    %c2_i32 = arith.constant 2 : i32
    %43 = arith.index_cast %c2_i32 : i32 to index
    %c0_22 = arith.constant 0 : index
    %c0_23 = arith.constant 0 : index
    %44 = vector.load %arg2[%43, %c0_22, %c0_23] : memref<3x128x128xf32, #tpu.memory_space<vmem>>, vector<1x128x128xf32>
    %45 = vector.shape_cast %44 : vector<1x128x128xf32> to vector<128x128xf32>
    %cst_24 = arith.constant dense<0.000000e+00> : vector<8x128xf32>
    %46 = tpu.matmul %42, %45, %cst_24 {dimension_numbers = #tpu.dot_dimension_numbers<[1], [0], [0], [1], [0, 0, 1, 1], [], []>} : vector<8x128xf32>, vector<128x128xf32>, vector<8x128xf32> -> vector<8x128xf32>
    %47 = arith.index_cast %c2_i32 : i32 to index
    %c0_25 = arith.constant 0 : index
    %c0_26 = arith.constant 0 : index
    %48 = vector.load %arg3[%47, %c0_25, %c0_26] : memref<3x1x128xf32, #tpu.memory_space<vmem>>, vector<1x1x128xf32>
    %49 = vector.shape_cast %48 : vector<1x1x128xf32> to vector<1x128xf32>
    %50 = vector.broadcast %49 : vector<1x128xf32> to vector<8x128xf32>
    %51 = arith.addf %46, %50 : vector<8x128xf32>
    %cst_27 = arith.constant 0.000000e+00 : f32
    %52 = vector.broadcast %cst_27 : f32 to vector<8x128xf32>
    %53 = arith.maximumf %51, %52 : vector<8x128xf32>
    %54 = arith.index_cast %c2_i32 : i32 to index
    %c0_28 = arith.constant 0 : index
    %c0_29 = arith.constant 0 : index
    %55 = vector.load %arg4[%54, %c0_28, %c0_29] : memref<3x128x128xf32, #tpu.memory_space<vmem>>, vector<1x128x128xf32>
    %56 = vector.shape_cast %55 : vector<1x128x128xf32> to vector<128x128xf32>
    %cst_30 = arith.constant dense<0.000000e+00> : vector<8x128xf32>
    %57 = tpu.matmul %53, %56, %cst_30 {dimension_numbers = #tpu.dot_dimension_numbers<[1], [0], [0], [1], [0, 0, 1, 1], [], []>} : vector<8x128xf32>, vector<128x128xf32>, vector<8x128xf32> -> vector<8x128xf32>
    %58 = arith.index_cast %c2_i32 : i32 to index
    %c0_31 = arith.constant 0 : index
    %c0_32 = arith.constant 0 : index
    %59 = vector.load %arg5[%58, %c0_31, %c0_32] : memref<3x1x128xf32, #tpu.memory_space<vmem>>, vector<1x1x128xf32>
    %60 = vector.shape_cast %59 : vector<1x1x128xf32> to vector<1x128xf32>
    %61 = vector.broadcast %60 : vector<1x128xf32> to vector<8x128xf32>
    %62 = arith.addf %57, %61 : vector<8x128xf32>
    %63 = arith.addf %42, %62 : vector<8x128xf32>
    %c3_i32 = arith.constant 3 : i32
    %c0_33 = arith.constant 0 : index
    %c0_34 = arith.constant 0 : index
    %64 = vector.load %arg6[%c0_33, %c0_34] : memref<8x128xf32, #tpu.memory_space<vmem>>, vector<8x128xf32>
    tpu.vector_store %arg6[%c0_33, %c0_34], %63 {strides = array<i32>} : memref<8x128xf32, #tpu.memory_space<vmem>>, vector<8x128xf32>,
    return
  }
  func.func @transform_0(%arg0: i32) -> (i32, i32) {
    %c0_i32 = arith.constant 0 : i32
    %c0_i32_0 = arith.constant 0 : i32
    %c0_i32_1 = arith.constant 0 : i32
    return %c0_i32, %c0_i32_0 : i32, i32
  }
  func.func @transform_1(%arg0: i32) -> (i32, i32, i32) {
    %c0_i32 = arith.constant 0 : i32
    %c0_i32_0 = arith.constant 0 : i32
    %c0_i32_1 = arith.constant 0 : i32
    %c0_i32_2 = arith.constant 0 : i32
    return %c0_i32, %c0_i32_0, %c0_i32_1 : i32, i32, i32
  }
  func.func @transform_2(%arg0: i32) -> (i32, i32, i32) {
    %c0_i32 = arith.constant 0 : i32
    %c0_i32_0 = arith.constant 0 : i32
    %c0_i32_1 = arith.constant 0 : i32
    %c0_i32_2 = arith.constant 0 : i32
    return %c0_i32, %c0_i32_0, %c0_i32_1 : i32, i32, i32
  }
  func.func @transform_3(%arg0: i32) -> (i32, i32, i32) {
    %c0_i32 = arith.constant 0 : i32
    %c0_i32_0 = arith.constant 0 : i32
    %c0_i32_1 = arith.constant 0 : i32
    %c0_i32_2 = arith.constant 0 : i32
    return %c0_i32, %c0_i32_0, %c0_i32_1 : i32, i32, i32
  }
  func.func @transform_4(%arg0: i32) -> (i32, i32, i32) {
    %c0_i32 = arith.constant 0 : i32
    %c0_i32_0 = arith.constant 0 : i32
    %c0_i32_1 = arith.constant 0 : i32
    %c0_i32_2 = arith.constant 0 : i32
    return %c0_i32, %c0_i32_0, %c0_i32_1 : i32, i32, i32
  }
  func.func @transform_5(%arg0: i32) -> (i32, i32) {
    %c0_i32 = arith.constant 0 : i32
    %c0_i32_0 = arith.constant 0 : i32
    %c0_i32_1 = arith.constant 0 : i32
    return %c0_i32, %c0_i32_0 : i32, i32
  }
}

</mosaic_0001>

<bundles_post_ra>
// kernel: resnet_forward.1
= control target key start
LH: loop header
LB: loop body
LE: loop exit
PB: predicated region body
PF: predicated region fallthrough
CT: control target
= control target key end

     0   :  { %s745_s0 = inlined_call_operand.vmem [shape: f32[8,128], index: 0, kind: input, shape index: {}]   ;;  %s746_s1 = inlined_call_operand.vmem [shape: f32[3,128,128], index: 1, kind: input, shape index: {}]   ;;  %s747_s2 = inlined_call_operand.vmem [shape: f32[3,1,128], index: 2, kind: input, shape index: {}]   ;;  %s748_s3 = inlined_call_operand.vmem [shape: f32[3,128,128], index: 3, kind: input, shape index: {}]   ;;  %s749_s4 = inlined_call_operand.vmem [shape: f32[3,1,128], index: 4, kind: input, shape index: {}]   ;;  %s750_s5 = inlined_call_operand.hbm [shape: f32[8,128], index: 5, kind: output, shape index: {}]  }
   0x1   :  { %v37_v0 = vld [vmem:[%s746_s1 + $0x78] sm:$0xff]  ;;  %v36_v1 = vld [vmem:[%s746_s1 + $0x70] sm:$0xff]  ;;  %v35_v2 = vld [vmem:[%s746_s1 + $0x68] sm:$0xff] }
   0x2   :  { %42 = vmatpush.msra.mxu0 %v37_v0  ;;  %v34_v3 = vld [vmem:[%s746_s1 + $0x60] sm:$0xff]  ;;  %v78_v4 = vld [vmem:[%s748_s3 + $0x78] sm:$0xff]  ;;  %v77_v6 = vld [vmem:[%s748_s3 + $0x70] sm:$0xff] }
   0x3   :  { %v33_v5 = vld [vmem:[%s746_s1 + $0x58] sm:$0xff]  ;;  %83 = vmatpush.msra.mxu1 %v78_v4  ;;  %v76_v7 = vld [vmem:[%s748_s3 + $0x68] sm:$0xff]  ;;  %v32_v8 = vld [vmem:[%s746_s1 + $0x50] sm:$0xff] }
   0x4   :  { %43 = vmatpush.msra.mxu0 %v36_v1  ;;  %v31_v9 = vld [vmem:[%s746_s1 + $0x48] sm:$0xff]  ;;  %v75_v10 = vld [vmem:[%s748_s3 + $0x60] sm:$0xff]  ;;  %v74_v11 = vld [vmem:[%s748_s3 + $0x58] sm:$0xff] }
   0x5   :  { %84 = vmatpush.msra.mxu1 %v77_v6  ;;  %v30_v12 = vld [vmem:[%s746_s1 + $0x40] sm:$0xff] }
   0x6   :  { %44 = vmatpush.msra.mxu0 %v35_v2 }
   0x7   :  { %85 = vmatpush.msra.mxu1 %v76_v7 }
   0x8   :  { %45 = vmatpush.msra.mxu0 %v34_v3 }
   0x9   :  { %86 = vmatpush.msra.mxu1 %v75_v10 }
   0xa   :  { %46 = vmatpush.msra.mxu0 %v33_v5 }
   0xc   :  { %47 = vmatpush.msra.mxu0 %v32_v8 }
   0xd   :  { %10 = vsyncpa [#allocation3], 0  ;;  %v73_v13 = vld [vmem:[%s748_s3 + $0x50] sm:$0xff]  ;;  %v29_v14 = vld [vmem:[%s746_s1 + $0x38] sm:$0xff]  ;;  %87 = vmatpush.msra.mxu1 %v74_v11  ;;  %s394_s16 = smov [#allocation2]  }
   0xe   :  { %48 = vmatpush.msra.mxu0 %v31_v9  ;;  %v72_v15 = vld [vmem:[%s748_s3 + $0x48] sm:$0xff]  ;;  %v28_v16 = vld [vmem:[%s746_s1 + $0x30] sm:$0xff]  ;;  %v71_v17 = vld [vmem:[%s748_s3 + $0x40] sm:$0xff]  ;;  %s282_s17 = sshll.u32 %s394_s16, 4  ;;  %s283_s17 = int_to_ptr.vmem [resolvable:$true] %s282_s17 }
   0xf   :  { %88 = vmatpush.msra.mxu1 %v73_v13  ;;  %v27_v18 = vld [vmem:[%s746_s1 + $0x28] sm:$0xff]  ;;  %v70_v19 = vld [vmem:[%s748_s3 + $0x38] sm:$0xff]  ;;  %v26_v20 = vld [vmem:[%s746_s1 + $0x20] sm:$0xff] }
  0x10   :  { %49 = vmatpush.msra.mxu0 %v30_v12  ;;  %v69_v21 = vld [vmem:[%s748_s3 + $0x30] sm:$0xff]  ;;  %v25_v22 = vld [vmem:[%s746_s1 + $0x18] sm:$0xff]  ;;  %v68_v23 = vld [vmem:[%s748_s3 + $0x28] sm:$0xff] }
  0x11   :  { %89 = vmatpush.msra.mxu1 %v72_v15  ;;  %v24_v24 = vld [vmem:[%s746_s1 + $0x10] sm:$0xff]  ;;  %v67_v25 = vld [vmem:[%s748_s3 + $0x20] sm:$0xff]  ;;  %v23_v26 = vld [vmem:[%s746_s1 + $0x8] sm:$0xff] }
  0x12   :  { %50 = vmatpush.msra.mxu0 %v29_v14  ;;  %v66_v27 = vld [vmem:[%s748_s3 + $0x18] sm:$0xff]  ;;  %v22_v28 = vld [vmem:[%s746_s1] sm:$0xff]  ;;  %v65_v30 = vld [vmem:[%s748_s3 + $0x10] sm:$0xff] }
  0x13   :  { %90 = vmatpush.msra.mxu1 %v71_v17  ;;  %v515_v29 = vld [vmem:[%s745_s0] sm:$0xff]  ;;  %v64_v31 = vld [vmem:[%s748_s3 + $0x8] sm:$0xff]  ;;  %v308_v33 = vld [vmem:[%s746_s1 + $0xf8] sm:$0xff] }
  0x14   :  { %51 = vmatpush.msra.mxu0 %v28_v16  ;;  %v63_v32 = vld [vmem:[%s748_s3] sm:$0xff]  ;;  %v307_v34 = vld [vmem:[%s746_s1 + $0xf0] sm:$0xff]  ;;  %126 = vmatpush.msra.mxu2 %v308_v33  ;;  %v306_v35 = vld [vmem:[%s746_s1 + $0xe8] sm:$0xff] }
  0x15   :  { %91 = vmatpush.msra.mxu1 %v70_v19  ;;  %v305_v36 = vld [vmem:[%s746_s1 + $0xe0] sm:$0xff]  ;;  %v304_v37 = vld [vmem:[%s746_s1 + $0xd8] sm:$0xff]  ;;  %v303_v38 = vld [vmem:[%s746_s1 + $0xd0] sm:$0xff] }
  0x16   :  { %52 = vmatpush.msra.mxu0 %v27_v18  ;;  %127 = vmatpush.msra.mxu2 %v307_v34  ;;  %v302_v39 = vld [vmem:[%s746_s1 + $0xc8] sm:$0xff]  ;;  %v301_v40 = vld [vmem:[%s746_s1 + $0xc0] sm:$0xff]  ;;  %v300_v41 = vld [vmem:[%s746_s1 + $0xb8] sm:$0xff] }
  0x17   :  { %92 = vmatpush.msra.mxu1 %v69_v21  ;;  %v299_v42 = vld [vmem:[%s746_s1 + $0xb0] sm:$0xff]  ;;  %v298_v43 = vld [vmem:[%s746_s1 + $0xa8] sm:$0xff]  ;;  %v297_v44 = vld [vmem:[%s746_s1 + $0xa0] sm:$0xff] }
  0x18   :  { %53 = vmatpush.msra.mxu0 %v26_v20  ;;  %128 = vmatpush.msra.mxu2 %v306_v35  ;;  %v296_v45 = vld [vmem:[%s746_s1 + $0x98] sm:$0xff]  ;;  %v362_v46 = vld [vmem:[%s747_s2] ss:$0 sm:$0xff]  ;;  %v295_v50 = vld [vmem:[%s746_s1 + $0x90] sm:$0xff] }
  0x19   :  { %93 = vmatpush.msra.mxu1 %v68_v23  ;;  %v294_v51 = vld [vmem:[%s746_s1 + $0x88] sm:$0xff]  ;;  %v293_v52 = vld [vmem:[%s746_s1 + $0x80] sm:$0xff]  ;;  %v325_v53 = vld [vmem:[%s748_s3 + $0xf8] sm:$0xff] }
  0x1a   :  { %54 = vmatpush.msra.mxu0 %v25_v22  ;;  %129 = vmatpush.msra.mxu2 %v305_v36  ;;  %v324_v54 = vld [vmem:[%s748_s3 + $0xf0] sm:$0xff]  ;;  %v323_v55 = vld [vmem:[%s748_s3 + $0xe8] sm:$0xff]  ;;  %v322_v56 = vld [vmem:[%s748_s3 + $0xe0] sm:$0xff] }
  0x1b   :  { %94 = vmatpush.msra.mxu1 %v67_v25  ;;  %169 = vmatpush.msra.mxu3 %v325_v53  ;;  %v321_v57 = vld [vmem:[%s748_s3 + $0xd8] sm:$0xff]  ;;  %v320_v58 = vld [vmem:[%s748_s3 + $0xd0] sm:$0xff]  ;;  %v319_v59 = vld [vmem:[%s748_s3 + $0xc8] sm:$0xff] }
  0x1c   :  { %55 = vmatpush.msra.mxu0 %v24_v24  ;;  %130 = vmatpush.msra.mxu2 %v304_v37  ;;  %v318_v60 = vld [vmem:[%s748_s3 + $0xc0] sm:$0xff]  ;;  %v317_v61 = vld [vmem:[%s748_s3 + $0xb8] sm:$0xff]  ;;  %v316_v62 = vld [vmem:[%s748_s3 + $0xb0] sm:$0xff] }
  0x1d   :  { %95 = vmatpush.msra.mxu1 %v66_v27  ;;  %170 = vmatpush.msra.mxu3 %v324_v54  ;;  %v315_v63 = vld [vmem:[%s748_s3 + $0xa8] sm:$0xff]  ;;  %v314_v0 = vld [vmem:[%s748_s3 + $0xa0] sm:$0xff]  ;;  %v313_v1 = vld [vmem:[%s748_s3 + $0x98] sm:$0xff] }
  0x1e   :  { %56 = vmatpush.msra.mxu0 %v23_v26  ;;  %131 = vmatpush.msra.mxu2 %v303_v38  ;;  %v363_v2 = vld [vmem:[%s749_s4] ss:$0 sm:$0xff]  ;;  %v312_v6 = vld [vmem:[%s748_s3 + $0x90] sm:$0xff]  ;;  %v311_v7 = vld [vmem:[%s748_s3 + $0x88] sm:$0xff] }
  0x1f   :  { %96 = vmatpush.msra.mxu1 %v65_v30  ;;  %171 = vmatpush.msra.mxu3 %v323_v55  ;;  %v310_v8 = vld [vmem:[%s748_s3 + $0x80] sm:$0xff]  ;;  %v342_v9 = vld [vmem:[%s746_s1 + $0x178] sm:$0xff]  ;;  %v341_v10 = vld [vmem:[%s746_s1 + $0x170] sm:$0xff] }
  0x20   :  { %57 = vmatpush.msra.mxu0 %v22_v28  ;;  %132 = vmatpush.msra.mxu2 %v302_v39  ;;  %v340_v11 = vld [vmem:[%s746_s1 + $0x168] sm:$0xff]  ;;  %v339_v12 = vld [vmem:[%s746_s1 + $0x160] sm:$0xff]  ;;  %v338_v13 = vld [vmem:[%s746_s1 + $0x158] sm:$0xff] }
  0x21   :  { %58 = vmatmul.f32.vlgmr.msra.gmra.mxu0 %v515_v29  ;;  %97 = vmatpush.msra.mxu1 %v64_v31  ;;  %v337_v14 = vld [vmem:[%s746_s1 + $0x150] sm:$0xff]  ;;  %v336_v15 = vld [vmem:[%s746_s1 + $0x148] sm:$0xff]  ;;  %v335_v16 = vld [vmem:[%s746_s1 + $0x140] sm:$0xff] }
  0x22   :  { %133 = vmatpush.msra.mxu2 %v301_v40  ;;  %172 = vmatpush.msra.mxu3 %v322_v56  ;;  %v334_v17 = vld [vmem:[%s746_s1 + $0x138] sm:$0xff]  ;;  %v333_v18 = vld [vmem:[%s746_s1 + $0x130] sm:$0xff]  ;;  %v332_v19 = vld [vmem:[%s746_s1 + $0x128] sm:$0xff] }
  0x23   :  { %98 = vmatpush.msra.mxu1 %v63_v32  ;;  %212 = vmatpush.msrb.mxu0 %v342_v9  ;;  %v331_v20 = vld [vmem:[%s746_s1 + $0x120] sm:$0xff]  ;;  %v330_v21 = vld [vmem:[%s746_s1 + $0x118] sm:$0xff]  ;;  %v329_v26 = vld [vmem:[%s746_s1 + $0x110] sm:$0xff] }
  0x24   :  { %134 = vmatpush.msra.mxu2 %v300_v41  ;;  %173 = vmatpush.msra.mxu3 %v321_v57  ;;  %v364_v22 = vld [vmem:[%s747_s2 + $0x1] ss:$0 sm:$0xff]  ;;  %v328_v27 = vld [vmem:[%s746_s1 + $0x108] sm:$0xff]  ;;  %v358_v30 = vld [vmem:[%s748_s3 + $0x170] sm:$0xff] }
  0x25   :  { %213 = vmatpush.msrb.mxu0 %v341_v10  ;;  %v327_v28 = vld [vmem:[%s746_s1 + $0x100] sm:$0xff]  ;;  %v357_v31 = vld [vmem:[%s748_s3 + $0x168] sm:$0xff]  ;;  %v355_v33 = vld [vmem:[%s748_s3 + $0x158] sm:$0xff] }
  0x26   :  { %135 = vmatpush.msra.mxu2 %v299_v42  ;;  %174 = vmatpush.msra.mxu3 %v320_v58  ;;  %v356_v32 = vld [vmem:[%s748_s3 + $0x160] sm:$0xff]  ;;  %v354_v34 = vld [vmem:[%s748_s3 + $0x150] sm:$0xff]  ;;  %v353_v35 = vld [vmem:[%s748_s3 + $0x148] sm:$0xff] }
  0x27   :  { %214 = vmatpush.msrb.mxu0 %v340_v11  ;;  %v352_v36 = vld [vmem:[%s748_s3 + $0x140] sm:$0xff]  ;;  %v351_v37 = vld [vmem:[%s748_s3 + $0x138] sm:$0xff]  ;;  %v350_v38 = vld [vmem:[%s748_s3 + $0x130] sm:$0xff] }
  0x28   :  { %136 = vmatpush.msra.mxu2 %v298_v43  ;;  %175 = vmatpush.msra.mxu3 %v319_v59  ;;  %v349_v39 = vld [vmem:[%s748_s3 + $0x128] sm:$0xff]  ;;  %v348_v40 = vld [vmem:[%s748_s3 + $0x120] sm:$0xff]  ;;  %v347_v41 = vld [vmem:[%s748_s3 + $0x118] sm:$0xff] }
  0x29   :  { %215 = vmatpush.msrb.mxu0 %v339_v12  ;;  %v365_v42 = vld [vmem:[%s749_s4 + $0x1] ss:$0 sm:$0xff]  ;;  %v367_v53 = vld [vmem:[%s749_s4 + $0x2] ss:$0 sm:$0xff] }
  0x2a   :  { %137 = vmatpush.msra.mxu2 %v297_v44  ;;  %176 = vmatpush.msra.mxu3 %v318_v60 }
  0x2b   :  { %216 = vmatpush.msrb.mxu0 %v338_v13 }
  0x2c   :  { %138 = vmatpush.msra.mxu2 %v296_v45  ;;  %177 = vmatpush.msra.mxu3 %v317_v61 }
  0x2d   :  { %217 = vmatpush.msrb.mxu0 %v337_v14 }
  0x2e   :  { %139 = vmatpush.msra.mxu2 %v295_v50  ;;  %178 = vmatpush.msra.mxu3 %v316_v62 }
  0x2f   :  { %218 = vmatpush.msrb.mxu0 %v336_v15 }
  0x30   :  { %140 = vmatpush.msra.mxu2 %v294_v51  ;;  %179 = vmatpush.msra.mxu3 %v315_v63 }
  0x31   :  { %219 = vmatpush.msrb.mxu0 %v335_v16 }
  0x32   :  { %141 = vmatpush.msra.mxu2 %v293_v52  ;;  %180 = vmatpush.msra.mxu3 %v314_v0 }
  0x33   :  { %220 = vmatpush.msrb.mxu0 %v334_v17 }
  0x34   :  { %181 = vmatpush.msra.mxu3 %v313_v1 }
  0x35   :  { %221 = vmatpush.msrb.mxu0 %v333_v18 }
  0x36   :  { %182 = vmatpush.msra.mxu3 %v312_v6 }
  0x37   :  { %222 = vmatpush.msrb.mxu0 %v332_v19 }
  0x38   :  { %183 = vmatpush.msra.mxu3 %v311_v7 }
  0x39   :  { %223 = vmatpush.msrb.mxu0 %v331_v20 }
  0x3a   :  { %184 = vmatpush.msra.mxu3 %v310_v8 }
  0x3b   :  { %224 = vmatpush.msrb.mxu0 %v330_v21 }
  0x3d   :  { %225 = vmatpush.msrb.mxu0 %v329_v26 }
  0x3f   :  { %226 = vmatpush.msrb.mxu0 %v328_v27 }
  0x41   :  { %227 = vmatpush.msrb.mxu0 %v327_v28 }
  0x9e   :  { %v59_v47 = vpop.f32.mrf.mxu0 }
  0x9f   :  { %v60_v48 = vadd.f32 %v362_v46, %v59_v47  ;;  %v346_v46 = vld [vmem:[%s748_s3 + $0x110] sm:$0xff]  ;;  %v345_v47 = vld [vmem:[%s748_s3 + $0x108] sm:$0xff] }
  0xa1   :  { %v62_v49 = vmax.f32 %v60_v48, 0.0  ;;  %v344_v48 = vld [vmem:[%s748_s3 + $0x100] sm:$0xff] }
  0xa3   :  { %99 = vmatmul.f32.vlgmr.msra.gmra.mxu1 %v62_v49  ;;  %v366_v49 = vld [vmem:[%s747_s2 + $0x2] ss:$0 sm:$0xff] }
 0x120   :  { %v100_v3 = vpop.f32.mrf.mxu1 }
 0x121   :  { %v101_v4 = vadd.f32 %v363_v2, %v100_v3 }
 0x123   :  { %v621_v5 = vadd.f32 %v101_v4, %v515_v29  ;;  %v359_v29 = vld [vmem:[%s748_s3 + $0x178] sm:$0xff]  ;;  %s284_s3 = sshll.u32 %s750_s5, 4  ;;  %s285_s3 = int_to_ptr.hbm [resolvable:$true] %s284_s3 }
 0x124   :  { %255 = vmatpush.msrb.mxu1 %v359_v29 }
 0x125   :  { %142 = vmatmul.f32.vlgmr.msra.gmra.mxu2 %v621_v5 }
 0x126   :  { %256 = vmatpush.msrb.mxu1 %v358_v30 }
 0x128   :  { %257 = vmatpush.msrb.mxu1 %v357_v31 }
 0x12a   :  { %258 = vmatpush.msrb.mxu1 %v356_v32 }
 0x12c   :  { %259 = vmatpush.msrb.mxu1 %v355_v33 }
 0x12e   :  { %260 = vmatpush.msrb.mxu1 %v354_v34 }
 0x130   :  { %261 = vmatpush.msrb.mxu1 %v353_v35 }
 0x132   :  { %262 = vmatpush.msrb.mxu1 %v352_v36 }
 0x134   :  { %263 = vmatpush.msrb.mxu1 %v351_v37 }
 0x136   :  { %264 = vmatpush.msrb.mxu1 %v350_v38 }
 0x138   :  { %265 = vmatpush.msrb.mxu1 %v349_v39 }
 0x13a   :  { %266 = vmatpush.msrb.mxu1 %v348_v40 }
 0x13c   :  { %267 = vmatpush.msrb.mxu1 %v347_v41 }
 0x13e   :  { %268 = vmatpush.msrb.mxu1 %v346_v46 }
 0x140   :  { %269 = vmatpush.msrb.mxu1 %v345_v47 }
 0x142   :  { %270 = vmatpush.msrb.mxu1 %v344_v48 }
 0x1a8   :  { %v143_v23 = vpop.f32.mrf.mxu2 }
 0x1a9   :  { %v144_v24 = vadd.f32 %v364_v22, %v143_v23 }
 0x1ab   :  { %v146_v25 = vmax.f32 %v144_v24, 0.0 }
 0x1ad   :  { %185 = vmatmul.f32.vlgmr.msra.gmra.mxu3 %v146_v25 }
 0x230   :  { %v186_v43 = vpop.f32.mrf.mxu3 }
 0x231   :  { %v187_v44 = vadd.f32 %v365_v42, %v186_v43 }
 0x233   :  { %v189_v45 = vadd.f32 %v187_v44, %v621_v5 }
 0x235   :  { %228 = vmatmul.f32.vlgmr.msrb.gmra.mxu0 %v189_v45 }
 0x2b2   :  { %v229_v50 = vpop.f32.mrf.mxu0 }
 0x2b3   :  { %v230_v51 = vadd.f32 %v366_v49, %v229_v50 }
 0x2b5   :  { %v232_v52 = vmax.f32 %v230_v51, 0.0 }
 0x2b7   :  { %271 = vmatmul.f32.vlgmr.msrb.gmra.mxu1 %v232_v52 }
 0x334   :  { %v272_v54 = vpop.f32.mrf.mxu1 }
 0x335   :  { %v273_v55 = vadd.f32 %v367_v53, %v272_v54 }
 0x337   :  { %v275_v56 = vadd.f32 %v273_v55, %v189_v45 }
 0x339   :  { %276 = vst [vmem:[#allocation2] sm:$0xff] %v275_v56 }
 0x33a   :  { %287 = dma.vmem_to_hbm [thread:$0]  %s283_s17, 128, %s285_s3, [#allocation3]  }
 0x33b   :  { %392 = dma.done.wait [#allocation3], 128  }
 0x33c   :  { %393 = vsyncadd [#allocation3], 4294967168 }
 0x33d   :  { %292 = vsyncpa [#allocation3], 1 }

</bundles_post_ra>
